<compile_context>
chip_gen: v6e
topology: v6e:2x2x1
jax: 0.10.0
libtpu: 0.0.40
codegen_flags: <defaults>
</compile_context>

<pallas_src>
import functools

import jax
import jax.numpy as jnp
from jax.experimental import pallas as pl
from jax.experimental.pallas import tpu as pltpu


# ---------------------------------------------------------------------------
# Kernel
# ---------------------------------------------------------------------------

def _mlp_kernel(in_dim, x_ref, w_ref, misc_ref, out_ref):
    # x: (block_b, in) f32 in HBM/VMEM; cast to bf16 in-kernel for the MXU.
    x = x_ref[...].astype(jnp.bfloat16)

    # Packed bf16 weight slab (in_dim + 96, 64): static ref slices (free).
    w1 = w_ref[0:in_dim, :]                       # (in, 64)  fc1 (BN folded)
    w2 = w_ref[in_dim:in_dim + 64, 0:32]          # (64, 32)  fc2 (BN folded)
    wh = w_ref[in_dim + 64:in_dim + 96, 0:32]     # (32, 32)  fused head hidden

    # Packed f32 misc slab (8, 64).
    wlt = misc_ref[0:2, 0:32]                     # (2, 32) block-diag final (transposed)
    blast = misc_ref[0:2, 32:33]                  # (2, 1)  final biases
    sh1 = misc_ref[2:3, :]                        # (1, 64) folded bias+BN shift
    sh2 = misc_ref[3:4, 0:32]                     # (1, 32)
    shh = misc_ref[4:5, 0:32]                     # (1, 32)

    # fc1 + bn1 (folded) -> relu   (dropout = identity in eval)
    h = jnp.dot(x, w1, preferred_element_type=jnp.float32) + sh1
    h = jnp.maximum(h, 0.0).astype(jnp.bfloat16)

    # fc2 + bn2 (folded) -> relu
    h = jnp.dot(h, w2, preferred_element_type=jnp.float32) + sh2
    h = jnp.maximum(h, 0.0).astype(jnp.bfloat16)

    # fused head hidden: [fc_event_time_hidden | fc_probability_hidden] + BN -> relu
    g = jnp.dot(h, wh, preferred_element_type=jnp.float32) + shh
    g = jnp.maximum(g, 0.0)                       # (block_b, 32) f32

    # Fused final layer, NT-style -> lane-dense (2, block_b) result.
    # (Kept NT so the output stays lane-dense; if bundle dumps show an XLU
    # transpose of g dominating at large block_b, restructure per review.)
    y = jax.lax.dot_general(
        wlt, g,
        dimension_numbers=(((1,), (1,)), ((), ())),
        preferred_element_type=jnp.float32,
    ) + blast                                     # (2, block_b)

    # Split epilogue: sigmoid only on the probability row (halves EUP work).
    out_ref[0:1, :] = jnp.maximum(y[0:1, :], 0.0)     # event-time head: ReLU
    out_ref[1:2, :] = jax.nn.sigmoid(y[1:2, :])       # probability head: sigmoid


# ---------------------------------------------------------------------------
# Parameter construction (mimics torch defaults) and wrapper-side folding.
# ---------------------------------------------------------------------------

def _linear_init(key, fan_in, fan_out):
    """torch.nn.Linear default init: uniform(+/- 1/sqrt(fan_in)); W stored (in, out)."""
    kw, kb = jax.random.split(key)
    bound = 1.0 / float(fan_in) ** 0.5
    w = jax.random.uniform(kw, (fan_in, fan_out), jnp.float32, -bound, bound)
    b = jax.random.uniform(kb, (fan_out,), jnp.float32, -bound, bound)
    return w, b


def _bn_default(dim):
    """BatchNorm1d defaults: gamma=1, beta=0, running_mean=0, running_var=1."""
    return (jnp.ones((dim,), jnp.float32), jnp.zeros((dim,), jnp.float32),
            jnp.zeros((dim,), jnp.float32), jnp.ones((dim,), jnp.float32))


def make_params(input_size, key):
    keys = jax.random.split(key, 6)
    p = {}
    p["w1"], p["b1"] = _linear_init(keys[0], input_size, 64)
    p["w2"], p["b2"] = _linear_init(keys[1], 64, 32)
    p["wt1"], p["bt1"] = _linear_init(keys[2], 32, 16)
    p["wt2"], p["bt2"] = _linear_init(keys[3], 16, 1)
    p["wp1"], p["bp1"] = _linear_init(keys[4], 32, 16)
    p["wp2"], p["bp2"] = _linear_init(keys[5], 16, 1)
    p["bn1"] = _bn_default(64)
    p["bn2"] = _bn_default(32)
    p["bnt"] = _bn_default(16)
    p["bnp"] = _bn_default(16)
    return p


def fold_params(p, eps=1e-5, matmul_dtype=jnp.bfloat16):
    """Fold BN into weights, fuse the two heads, and pack into 2 kernel operands."""
    def fold(w, b, bn):
        g, be, m, v = bn
        scale = g / jnp.sqrt(v + eps)
        w_f = w * scale[None, :]
        shift = b * scale + (be - m * scale)
        return w_f, shift

    w1, sh1 = fold(p["w1"], p["b1"], p["bn1"])      # (in,64), (64,)
    w2, sh2 = fold(p["w2"], p["b2"], p["bn2"])      # (64,32), (32,)
    wt1, sht = fold(p["wt1"], p["bt1"], p["bnt"])   # (32,16), (16,)
    wp1, shp = fold(p["wp1"], p["bp1"], p["bnp"])   # (32,16), (16,)

    # Fused head hidden: cols [0:16) -> event-time head, [16:32) -> probability.
    wh = jnp.concatenate([wt1, wp1], axis=1)        # (32, 32)
    shh = jnp.concatenate([sht, shp])               # (32,)

    in_dim = int(w1.shape[0])
    n_t = int(wt1.shape[1])                         # 16

    # bf16 weight slab: rows [0,in)=w1, [in,in+64)=w2, [in+64,in+96)=wh.
    wslab = jnp.zeros((in_dim + 96, 64), jnp.float32)
    wslab = wslab.at[0:in_dim, :].set(w1)
    wslab = wslab.at[in_dim:in_dim + 64, 0:32].set(w2)
    wslab = wslab.at[in_dim + 64:in_dim + 96, 0:32].set(wh)
    wslab = wslab.astype(matmul_dtype)

    # f32 misc slab (8, 64):
    #   row 0, cols 0:16  = wt2 (event-time final weights), col 32 = bt2
    #   row 1, cols 16:32 = wp2 (probability final weights), col 32 = bp2
    #   row 2             = sh1 (64)
    #   row 3, cols 0:32  = sh2
    #   row 4, cols 0:32  = shh
    misc = jnp.zeros((8, 64), jnp.float32)
    misc = misc.at[0, 0:n_t].set(p["wt2"][:, 0])
    misc = misc.at[1, n_t:2 * n_t].set(p["wp2"][:, 0])
    misc = misc.at[0, 32].set(p["bt2"][0])
    misc = misc.at[1, 32].set(p["bp2"][0])
    misc = misc.at[2, :].set(sh1)
    misc = misc.at[3, 0:32].set(sh2)
    misc = misc.at[4, 0:32].set(shh)

    return {"wslab": wslab, "misc": misc}


# ---------------------------------------------------------------------------
# Wrapper
# ---------------------------------------------------------------------------

def _pick_block_b(batch, cap=2048):
    """Batch tile: multiple of 256, <= cap; >= 2 tiles for big batches (v7x megacore)."""
    if batch <= 2 * 256:
        return 256
    per_core = -(-batch // 2)                     # cdiv(batch, 2)
    per_core = -(-per_core // 256) * 256          # round up to multiple of 256
    return min(cap, per_core)


@functools.partial(jax.jit, static_argnames=("block_b",))
def _forward(x, wslab, misc, *, block_b):
    B, in_dim = x.shape
    assert wslab.shape[0] == in_dim + 96, "weight slab does not match input size"

    n_tiles = pl.cdiv(B, block_b)
    Bp = n_tiles * block_b

    kernel = functools.partial(_mlp_kernel, in_dim)

    flops = 2 * Bp * (in_dim * 64 + 64 * 32 + 32 * 32 + 32 * 2)
    bytes_accessed = Bp * (in_dim * 4 + 2 * 4) + wslab.size * 2 + misc.size * 4

    out = pl.pallas_call(
        kernel,
        grid=(n_tiles,),
        in_specs=[
            pl.BlockSpec((block_b, in_dim), lambda i: (i, 0)),
            # Replicated parameters: whole array, same block every step
            # (kept resident in VMEM across grid steps).
            pl.BlockSpec(wslab.shape, lambda i: (0, 0)),
            pl.BlockSpec(misc.shape, lambda i: (0, 0)),
        ],
        out_specs=pl.BlockSpec((2, block_b), lambda i: (0, i)),
        out_shape=jax.ShapeDtypeStruct((2, Bp), jnp.float32),
        compiler_params=pltpu.CompilerParams(
            dimension_semantics=("parallel",),
            vmem_limit_bytes=32 * 1024 * 1024,
        ),
        cost_estimate=pl.CostEstimate(
            flops=int(flops),
            transcendentals=int(Bp),
            bytes_accessed=int(bytes_accessed),
        ),
    )(x, wslab, misc)

    # Row 0 = event-time head, row 1 = probability head; drop ragged-pad rows.
    t = out[0, :B].reshape(B, 1)
    q = out[1, :B].reshape(B, 1)
    return t, q


def real_neural_network_forward(x, fp, *, block_b=None):
    if block_b is None:
        block_b = _pick_block_b(int(x.shape[0]))
    return _forward(x, fp["wslab"], fp["misc"], block_b=block_b)


# ---------------------------------------------------------------------------
# Pure-JAX f32 reference of the eval-mode PyTorch forward.
# ---------------------------------------------------------------------------

def reference_forward(x, p, eps=1e-5):
    def bn(h, bnp):
        g, be, m, v = bnp
        return (h - m) / jnp.sqrt(v + eps) * g + be

    h = jnp.maximum(bn(x @ p["w1"] + p["b1"], p["bn1"]), 0.0)
    h = jnp.maximum(bn(h @ p["w2"] + p["b2"], p["bn2"]), 0.0)
    t = jnp.maximum(bn(h @ p["wt1"] + p["bt1"], p["bnt"]), 0.0)
    t = jnp.maximum(t @ p["wt2"] + p["bt2"], 0.0)
    q = jnp.maximum(bn(h @ p["wp1"] + p["bp1"], p["bnp"]), 0.0)
    q = jax.nn.sigmoid(q @ p["wp2"] + p["bp2"])
    return t, q


if __name__ == "__main__":
    key = jax.random.PRNGKey(0)
    k_params, k_x = jax.random.split(key)

    input_size = 32
    batch = 8

    raw_params = make_params(input_size, k_params)
    folded = fold_params(raw_params)

    # Small-batch case (single partial tile).
    x = jax.random.normal(k_x, (batch, input_size), jnp.float32)
    t, q = real_neural_network_forward(x, folded)
    jax.block_until_ready((t, q))

    assert t.shape == (batch, 1) and q.shape == (batch, 1)
    assert bool(jnp.all(t >= 0.0)) and bool(jnp.all((q >= 0.0) & (q <= 1.0)))

    t_ref, q_ref = reference_forward(x, raw_params)
    assert float(jnp.max(jnp.abs(t - t_ref))) < 0.1
    assert float(jnp.max(jnp.abs(q - q_ref))) < 0.1

    # Larger batch with a ragged last tile (exercises >=2-step parallel grid).
    x2 = jax.random.normal(k_x, (600, input_size), jnp.float32)
    t2, q2 = real_neural_network_forward(x2, folded)
    jax.block_until_ready((t2, q2))
    assert t2.shape == (600, 1) and q2.shape == (600, 1)

    t2_ref, q2_ref = reference_forward(x2, raw_params)
    assert float(jnp.max(jnp.abs(t2 - t2_ref))) < 0.1
    assert float(jnp.max(jnp.abs(q2 - q2_ref))) < 0.1

    print("KERNEL_OK")
</pallas_src>

<mosaic_0001>
module attributes {stable_mosaic.version = 11 : i64} {
  func.func @_mlp_kernel(%arg0: i32, %arg1: memref<256x32xf32, #tpu.memory_space<vmem>>, %arg2: memref<128x64xbf16, #tpu.memory_space<vmem>>, %arg3: memref<8x64xf32, #tpu.memory_space<vmem>>, %arg4: memref<2x256xf32, #tpu.memory_space<vmem>>) attributes {dimension_semantics = [#tpu.dimension_semantics<parallel>], iteration_bounds = array<i64: 1>, scalar_prefetch = 0 : i64, scratch_operands = 0 : i64, tpu.core_type = #tpu.core_type<tc>, window_params = [{transform_indices = @transform_0, window_bounds = array<i64: 256, 32>}, {pipeline_mode = #tpu.pipeline_mode<synchronous>, transform_indices = @transform_1, window_bounds = array<i64: 128, 64>}, {pipeline_mode = #tpu.pipeline_mode<synchronous>, transform_indices = @transform_2, window_bounds = array<i64: 8, 64>}, {transform_indices = @transform_3, window_bounds = array<i64: 2, 256>}]} {
    %c0 = arith.constant 0 : index
    %c0_0 = arith.constant 0 : index
    %0 = vector.load %arg1[%c0, %c0_0] : memref<256x32xf32, #tpu.memory_space<vmem>>, vector<256x32xf32>
    %1 = arith.truncf %0 : vector<256x32xf32> to vector<256x32xbf16>
    %c0_1 = arith.constant 0 : index
    %c0_2 = arith.constant 0 : index
    %2 = vector.load %arg2[%c0_1, %c0_2] : memref<128x64xbf16, #tpu.memory_space<vmem>>, vector<32x64xbf16>
    %c32 = arith.constant 32 : index
    %c0_3 = arith.constant 0 : index
    %3 = vector.load %arg2[%c32, %c0_3] : memref<128x64xbf16, #tpu.memory_space<vmem>>, vector<64x32xbf16>
    %c96 = arith.constant 96 : index
    %c0_4 = arith.constant 0 : index
    %4 = vector.load %arg2[%c96, %c0_4] : memref<128x64xbf16, #tpu.memory_space<vmem>>, vector<32x32xbf16>
    %c0_5 = arith.constant 0 : index
    %c0_6 = arith.constant 0 : index
    %5 = vector.load %arg3[%c0_5, %c0_6] : memref<8x64xf32, #tpu.memory_space<vmem>>, vector<2x32xf32>
    %c0_7 = arith.constant 0 : index
    %c32_8 = arith.constant 32 : index
    %6 = vector.load %arg3[%c0_7, %c32_8] : memref<8x64xf32, #tpu.memory_space<vmem>>, vector<2x1xf32>
    %c2 = arith.constant 2 : index
    %c0_9 = arith.constant 0 : index
    %7 = vector.load %arg3[%c2, %c0_9] : memref<8x64xf32, #tpu.memory_space<vmem>>, vector<1x64xf32>
    %c3 = arith.constant 3 : index
    %c0_10 = arith.constant 0 : index
    %8 = vector.load %arg3[%c3, %c0_10] : memref<8x64xf32, #tpu.memory_space<vmem>>, vector<1x32xf32>
    %c4 = arith.constant 4 : index
    %c0_11 = arith.constant 0 : index
    %9 = vector.load %arg3[%c4, %c0_11] : memref<8x64xf32, #tpu.memory_space<vmem>>, vector<1x32xf32>
    %cst = arith.constant dense<0.000000e+00> : vector<256x64xf32>
    %10 = tpu.matmul %1, %2, %cst {dimension_numbers = #tpu.dot_dimension_numbers<[1], [0], [0], [1], [0, 0, 1, 1], [], []>} : vector<256x32xbf16>, vector<32x64xbf16>, vector<256x64xf32> -> vector<256x64xf32>
    %11 = vector.broadcast %7 : vector<1x64xf32> to vector<256x64xf32>
    %12 = arith.addf %10, %11 : vector<256x64xf32>
    %cst_12 = arith.constant 0.000000e+00 : f32
    %13 = vector.broadcast %cst_12 : f32 to vector<256x64xf32>
    %14 = arith.maximumf %12, %13 : vector<256x64xf32>
    %15 = arith.truncf %14 : vector<256x64xf32> to vector<256x64xbf16>
    %cst_13 = arith.constant dense<0.000000e+00> : vector<256x32xf32>
    %16 = tpu.matmul %15, %3, %cst_13 {dimension_numbers = #tpu.dot_dimension_numbers<[1], [0], [0], [1], [0, 0, 1, 1], [], []>} : vector<256x64xbf16>, vector<64x32xbf16>, vector<256x32xf32> -> vector<256x32xf32>
    %17 = vector.broadcast %8 : vector<1x32xf32> to vector<256x32xf32>
    %18 = arith.addf %16, %17 : vector<256x32xf32>
    %cst_14 = arith.constant 0.000000e+00 : f32
    %19 = vector.broadcast %cst_14 : f32 to vector<256x32xf32>
    %20 = arith.maximumf %18, %19 : vector<256x32xf32>
    %21 = arith.truncf %20 : vector<256x32xf32> to vector<256x32xbf16>
    %cst_15 = arith.constant dense<0.000000e+00> : vector<256x32xf32>
    %22 = tpu.matmul %21, %4, %cst_15 {dimension_numbers = #tpu.dot_dimension_numbers<[1], [0], [0], [1], [0, 0, 1, 1], [], []>} : vector<256x32xbf16>, vector<32x32xbf16>, vector<256x32xf32> -> vector<256x32xf32>
    %23 = vector.broadcast %9 : vector<1x32xf32> to vector<256x32xf32>
    %24 = arith.addf %22, %23 : vector<256x32xf32>
    %cst_16 = arith.constant 0.000000e+00 : f32
    %25 = vector.broadcast %cst_16 : f32 to vector<256x32xf32>
    %26 = arith.maximumf %24, %25 : vector<256x32xf32>
    %cst_17 = arith.constant dense<0.000000e+00> : vector<2x256xf32>
    %27 = tpu.matmul %5, %26, %cst_17 {dimension_numbers = #tpu.dot_dimension_numbers<[1], [1], [0], [0], [0, 0, 1, 0], [], []>} : vector<2x32xf32>, vector<256x32xf32>, vector<2x256xf32> -> vector<2x256xf32>
    %28 = vector.broadcast %6 : vector<2x1xf32> to vector<2x256xf32>
    %29 = arith.addf %27, %28 : vector<2x256xf32>
    %30 = vector.extract_strided_slice %29 {offsets = [0, 0], sizes = [1, 256], strides = [1, 1]} : vector<2x256xf32> to vector<1x256xf32>
    %cst_18 = arith.constant 0.000000e+00 : f32
    %31 = vector.broadcast %cst_18 : f32 to vector<1x256xf32>
    %32 = arith.maximumf %30, %31 : vector<1x256xf32>
    %c0_19 = arith.constant 0 : index
    %c0_20 = arith.constant 0 : index
    %33 = vector.load %arg4[%c0_19, %c0_20] : memref<2x256xf32, #tpu.memory_space<vmem>>, vector<1x256xf32>
    tpu.vector_store %arg4[%c0_19, %c0_20], %32 {strides = array<i32>} : memref<2x256xf32, #tpu.memory_space<vmem>>, vector<1x256xf32>,
    %34 = vector.extract_strided_slice %29 {offsets = [1, 0], sizes = [1, 256], strides = [1, 1]} : vector<2x256xf32> to vector<1x256xf32>
    %35 = arith.negf %34 : vector<1x256xf32>
    %36 = math.exp %35 : vector<1x256xf32>
    %cst_21 = arith.constant 1.000000e+00 : f32
    %37 = vector.broadcast %cst_21 : f32 to vector<1x256xf32>
    %38 = arith.addf %37, %36 : vector<1x256xf32>
    %39 = arith.divf %37, %38 : vector<1x256xf32>
    %c1 = arith.constant 1 : index
    %c0_22 = arith.constant 0 : index
    %40 = vector.load %arg4[%c1, %c0_22] : memref<2x256xf32, #tpu.memory_space<vmem>>, vector<1x256xf32>
    tpu.vector_store %arg4[%c1, %c0_22], %39 {strides = array<i32>} : memref<2x256xf32, #tpu.memory_space<vmem>>, vector<1x256xf32>,
    return
  }
  func.func @transform_0(%arg0: i32) -> (i32, i32) {
    %c0_i32 = arith.constant 0 : i32
    %c0_i32_0 = arith.constant 0 : i32
    return %arg0, %c0_i32 : i32, i32
  }
  func.func @transform_1(%arg0: i32) -> (i32, i32) {
    %c0_i32 = arith.constant 0 : i32
    %c0_i32_0 = arith.constant 0 : i32
    %c0_i32_1 = arith.constant 0 : i32
    return %c0_i32, %c0_i32_0 : i32, i32
  }
  func.func @transform_2(%arg0: i32) -> (i32, i32) {
    %c0_i32 = arith.constant 0 : i32
    %c0_i32_0 = arith.constant 0 : i32
    %c0_i32_1 = arith.constant 0 : i32
    return %c0_i32, %c0_i32_0 : i32, i32
  }
  func.func @transform_3(%arg0: i32) -> (i32, i32) {
    %c0_i32 = arith.constant 0 : i32
    %c0_i32_0 = arith.constant 0 : i32
    return %c0_i32, %arg0 : i32, i32
  }
}

</mosaic_0001>

<bundles_post_ra>
// kernel: _forward.1
= control target key start
LH: loop header
LB: loop body
LE: loop exit
PB: predicated region body
PF: predicated region fallthrough
CT: control target
= control target key end

     0   :  { %vm99_vm0 = vcmask 261120   ;;  %vm385_vm1 = vcmask 523264   ;;  %s1859_s1 = inlined_call_operand.vmem [shape: bf16[128,64], index: 1, kind: input, shape index: {}]   ;;  %s1860_s0 = inlined_call_operand.vmem [shape: f32[8,32], index: 0, kind: input, shape index: {}]   ;;  %s1861_s2 = inlined_call_operand.vmem [shape: f32[8,64], index: 2, kind: input, shape index: {}]   ;;  %s1862_s3 = inlined_call_operand.vmem [shape: f32[2,256], index: 3, kind: output, shape index: {}]  }
   0x1   :  { %v1440_v0 = vld [vmem:[%s1859_s1 + $0x8] sm:$0xff]   ;;  %v1441_v1 = vld [vmem:[%s1859_s1] sm:$0xff]   ;;  %v17_v5 = vld [vmem:[%s1860_s0 + $0x10] sm:$0xff] }
   0x2   :  { %1321 = vmatprep.subr.bf16.mxu0 %v1440_v0  ;;  %v15_v2 = vld [vmem:[%s1860_s0] sm:$0xff]  ;;  %v16_v3 = vld [vmem:[%s1860_s0 + $0x8] sm:$0xff]  ;;  %1433 = vmatprep.subr.bf16.mxu1 %v1440_v0  ;;  %v18_v6 = vld [vmem:[%s1860_s0 + $0x18] sm:$0xff] }
   0x3   :  { %1322 = vmatpush3.bf16.msra.mxu0 %v1440_v0  ;;  %v47_v4 = vpack.c.bf16 %v16_v3, %v15_v2  ;;  %1435 = vmatpush3.bf16.msra.mxu1 %v1440_v0  ;;  %v19_v7 = vld [vmem:[%s1860_s0 + $0x20] sm:$0xff]  ;;  %v20_v8 = vld [vmem:[%s1860_s0 + $0x28] sm:$0xff]  ;;  %v48_v9 = vpack.c.bf16 %v18_v6, %v17_v5  ;;  %v37_v13 = vld [vmem:[%s1860_s0 + $0xb0] sm:$0xff] }
   0x4   :  { %1323 = vmatprep.subr.bf16.mxu0 %v1441_v1  ;;  %1434 = vmatprep.subr.bf16.mxu1 %v1441_v1  ;;  %v49_v10 = vpack.c.bf16 %v20_v8, %v19_v7  ;;  %v35_v11 = vld [vmem:[%s1860_s0 + $0xa0] sm:$0xff]  ;;  %v36_v12 = vld [vmem:[%s1860_s0 + $0xa8] sm:$0xff]  ;;  %v38_v14 = vld [vmem:[%s1860_s0 + $0xb8] sm:$0xff] }
   0x5   :  { %1325 = vmatprep.mubr.msk.bf16.mxu0 %vm99_vm0, %v47_v4  ;;  %v21_v15 = vld [vmem:[%s1860_s0 + $0x30] sm:$0xff]  ;;  %v57_v16 = vpack.c.bf16 %v36_v12, %v35_v11  ;;  %v58_v17 = vpack.c.bf16 %v38_v14, %v37_v13  ;;  %v39_v18 = vld [vmem:[%s1860_s0 + $0xc0] sm:$0xff]  ;;  %v40_v19 = vld [vmem:[%s1860_s0 + $0xc8] sm:$0xff] }
   0x6   :  { %v22_v20 = vld [vmem:[%s1860_s0 + $0x38] sm:$0xff]  ;;  %v23_v21 = vld [vmem:[%s1860_s0 + $0x40] sm:$0xff]  ;;  %v24_v22 = vld [vmem:[%s1860_s0 + $0x48] sm:$0xff]  ;;  %v59_v23 = vpack.c.bf16 %v40_v19, %v39_v18 }
   0x7   :  { %1324 = vmatpush3.bf16.msra.mxu0 %v1441_v1  ;;  %1436 = vmatpush3.bf16.msra.mxu1 %v1441_v1  ;;  %v41_v24 = vld [vmem:[%s1860_s0 + $0xd0] sm:$0xff]  ;;  %v42_v25 = vld [vmem:[%s1860_s0 + $0xd8] sm:$0xff]  ;;  %v43_v26 = vld [vmem:[%s1860_s0 + $0xe0] sm:$0xff]  ;;  %v50_v29 = vpack.c.bf16 %v22_v20, %v21_v15  ;;  %v51_v31 = vpack.c.bf16 %v24_v22, %v23_v21 }
   0x8   :  { %1345 = vmatprep.mubr.msk.bf16.mxu1 %vm99_vm0, %v57_v16  ;;  %v44_v27 = vld [vmem:[%s1860_s0 + $0xe8] sm:$0xff]  ;;  %v1443_v30 = vld [vmem:[%s1859_s1 + $0x20] sm:$0xff]   ;;  %v60_v32 = vpack.c.bf16 %v42_v25, %v41_v24  ;;  %v25_v34 = vld [vmem:[%s1860_s0 + $0x50] sm:$0xff] }
   0x9   :  { %v1442_v28 = vld [vmem:[%s1859_s1 + $0x28] sm:$0xff]   ;;  %v61_v33 = vpack.c.bf16 %v44_v27, %v43_v26  ;;  %v26_v35 = vld [vmem:[%s1860_s0 + $0x58] sm:$0xff]  ;;  %v27_v36 = vld [vmem:[%s1860_s0 + $0x60] sm:$0xff] }
   0xa   :  { %1326 = vmatmul.mubr.msk.bf16.vlgmr.msra.gmra.mxu0 %vm99_vm0, %v48_v9  ;;  %1346 = vmatmul.mubr.msk.bf16.vlgmr.msra.gmra.mxu1 %vm99_vm0, %v58_v17  ;;  %v28_v37 = vld [vmem:[%s1860_s0 + $0x68] sm:$0xff]  ;;  %v52_v38 = vpack.c.bf16 %v26_v35, %v25_v34  ;;  %v45_v39 = vld [vmem:[%s1860_s0 + $0xf0] sm:$0xff]  ;;  %v46_v40 = vld [vmem:[%s1860_s0 + $0xf8] sm:$0xff] }
   0xb   :  { %1329 = vmatprep.mubr.msk.bf16.mxu0 %vm99_vm0, %v49_v10  ;;  %1349 = vmatprep.mubr.msk.bf16.mxu1 %vm99_vm0, %v59_v23  ;;  %v53_v41 = vpack.c.bf16 %v28_v37, %v27_v36  ;;  %v62_v42 = vpack.c.bf16 %v46_v40, %v45_v39  ;;  %v29_v43 = vld [vmem:[%s1860_s0 + $0x70] sm:$0xff]  ;;  %v30_v44 = vld [vmem:[%s1860_s0 + $0x78] sm:$0xff]  ;;  %v31_v45 = vld [vmem:[%s1860_s0 + $0x80] sm:$0xff] }
   0xc   :  { %1357 = vmatprep.subr.bf16.mxu1 %v1442_v28  ;;  %v32_v46 = vld [vmem:[%s1860_s0 + $0x88] sm:$0xff]  ;;  %v54_v47 = vpack.c.bf16 %v30_v44, %v29_v43  ;;  %v33_v49 = vld [vmem:[%s1860_s0 + $0x90] sm:$0xff]  ;;  %v34_v50 = vld [vmem:[%s1860_s0 + $0x98] sm:$0xff] }
   0xd   :  { %1358 = vmatpush3.bf16.msra.mxu1 %v1442_v28  ;;  %v55_v48 = vpack.c.bf16 %v32_v46, %v31_v45  ;;  %v56_v51 = vpack.c.bf16 %v34_v50, %v33_v49  ;;  %v1444_v52 = vld [vmem:[%s1859_s1 + $0x18] sm:$0xff]   ;;  %v1445_v53 = vld [vmem:[%s1859_s1 + $0x10] sm:$0xff]   ;;  %v1617_v58 = vld [vmem:[%s1861_s2 + $0x2] ss:$0 sm:$0xff] }
   0xe   :  { %1359 = vmatprep.subr.bf16.mxu1 %v1443_v30  ;;  %v1446_v54 = vld [vmem:[%s1859_s1 + $0x38] sm:$0xff]   ;;  %v1447_v55 = vld [vmem:[%s1859_s1 + $0x30] sm:$0xff]  }
   0xf   :  { %1397 = vmatprep.subr.bf16.mxu0 %v1446_v54 }
  0x10   :  { %1398 = vmatpush3.bf16.msra.mxu0 %v1446_v54 }
  0x11   :  { %1360 = vmatpush3.bf16.msra.mxu1 %v1443_v30  ;;  %1399 = vmatprep.subr.bf16.mxu0 %v1447_v55 }
  0x12   :  { %1330 = vmatmul.mubr.msk.bf16.gmra.mxu0 %vm99_vm0, %v50_v29  ;;  %1350 = vmatmul.mubr.msk.bf16.gmra.mxu1 %vm99_vm0, %v60_v32 }
  0x13   :  { %1333 = vmatprep.mubr.msk.bf16.mxu0 %vm99_vm0, %v51_v31  ;;  %1353 = vmatprep.mubr.msk.bf16.mxu1 %vm99_vm0, %v61_v33 }
  0x14   :  { %1361 = vmatprep.subr.bf16.mxu1 %v1444_v52  ;;  %1400 = vmatpush3.bf16.msra.mxu0 %v1447_v55 }
  0x15   :  { %1362 = vmatpush3.bf16.msra.mxu1 %v1444_v52 }
  0x16   :  { %1363 = vmatprep.subr.bf16.mxu1 %v1445_v53 }
  0x19   :  { %1364 = vmatpush3.bf16.msra.mxu1 %v1445_v53 }
  0x1a   :  { %1334 = vmatmul.mubr.msk.bf16.gmra.mxu0 %vm99_vm0, %v52_v38  ;;  %1354 = vmatmul.mubr.msk.bf16.gmra.mxu1 %vm99_vm0, %v62_v42 }
  0x1b   :  { %1337 = vmatprep.mubr.msk.bf16.mxu0 %vm99_vm0, %v53_v41 }
  0x22   :  { %1338 = vmatmul.mubr.msk.bf16.gmra.mxu0 %vm99_vm0, %v54_v47 }
  0x23   :  { %1341 = vmatprep.mubr.msk.bf16.mxu0 %vm99_vm0, %v55_v48 }
  0x2a   :  { %1342 = vmatmul.mubr.msk.bf16.gmra.mxu0 %vm99_vm0, %v56_v51 }
  0xca   :  { %v1327_v56 = vpop.f32.mrf.mxu0  ;;  %v1619_v60 = vpop.f32.mrf.mxu1 }
  0xcb   :  { %v191_v63 = vadd.f32 %v1327_v56, %v1617_v58 }
  0xcc   :  { %v182_v57 = vpop.f32.mrf.mxu0  ;;  %v262_v4 = vpop.f32.mrf.mxu1 }
  0xcd   :  { %v183_v61 = vadd.f32 %v1617_v58, %v182_v57  ;;  %v311_v7 = vmax.f32 %v191_v63, 0.0 }
  0xce   :  { %v1328_v59 = vpop.f32.mrf.mxu0  ;;  %v1625_v12 = vpop.f32.mrf.mxu1 }
  0xcf   :  { %v194_v62 = vadd.f32 %v1328_v59, %v1617_v58  ;;  %v309_v5 = vmax.f32 %v183_v61, 0.0  ;;  %v263_v59 = vadd.f32 %v1617_v58, %v262_v4 }
  0xd0   :  { %v185_v0 = vpop.f32.mrf.mxu0  ;;  %v265_v20 = vpop.f32.mrf.mxu1 }
  0xd1   :  { %v186_v1 = vadd.f32 %v1617_v58, %v185_v0  ;;  %v312_v2 = vmax.f32 %v194_v62, 0.0  ;;  %v266_v61 = vadd.f32 %v1617_v58, %v265_v20  ;;  %v274_v20 = vadd.f32 %v1625_v12, %v1617_v58 }
  0xd2   :  { %v1331_v3 = vpop.f32.mrf.mxu0  ;;  %v1633_v28 = vpop.f32.mrf.mxu1 }
  0xd3   :  { %v310_v6 = vmax.f32 %v186_v1, 0.0  ;;  %v342_v10 = vpack.c.bf16 %v312_v2, %v311_v7  ;;  %v207_v15 = vadd.f32 %v1331_v3, %v1617_v58  ;;  %v330_v4 = vmax.f32 %v266_v61, 0.0 }
  0xd4   :  { %v198_v8 = vpop.f32.mrf.mxu0  ;;  %v278_v36 = vpop.f32.mrf.mxu1  ;;  %v287_v12 = vadd.f32 %v1633_v28, %v1617_v58 }
  0xd5   :  { %v341_v9 = vpack.c.bf16 %v310_v6, %v309_v5  ;;  %v199_v13 = vadd.f32 %v1617_v58, %v198_v8  ;;  %v315_v23 = vmax.f32 %v207_v15, 0.0  ;;  %v329_v6 = vmax.f32 %v263_v59, 0.0 }
  0xd6   :  { %v1332_v11 = vpop.f32.mrf.mxu0  ;;  %v1352_v44 = vpop.f32.mrf.mxu1 }
  0xd7   :  { %v210_v14 = vadd.f32 %v1332_v11, %v1617_v58  ;;  %1365 = vmatprep.mubr.msk.bf16.mxu1 %vm385_vm1, %v341_v9  ;;  %v313_v21 = vmax.f32 %v199_v13, 0.0  ;;  %v351_v15 = vpack.c.bf16 %v330_v4, %v329_v6 }
  0xd8   :  { %v201_v16 = vpop.f32.mrf.mxu0  ;;  %1366 = vmatmul.mubr.msk.bf16.vlgmr.msra.gmra.mxu1 %vm385_vm1, %v342_v10  ;;  %v281_v52 = vpop.f32.mrf.mxu1 }
  0xd9   :  { %v202_v17 = vadd.f32 %v1617_v58, %v201_v16  ;;  %v316_v18 = vmax.f32 %v210_v14, 0.0  ;;  %v279_v16 = vadd.f32 %v1617_v58, %v278_v36 }
  0xda   :  { %v1335_v19 = vpop.f32.mrf.mxu0  ;;  %v1355_v0 = vpop.f32.mrf.mxu1 }
  0xdb   :  { %v314_v22 = vmax.f32 %v202_v17, 0.0  ;;  %v344_v26 = vpack.c.bf16 %v316_v18, %v315_v23  ;;  %v223_v31 = vadd.f32 %v1335_v19, %v1617_v58  ;;  %v282_v17 = vadd.f32 %v1617_v58, %v281_v52 }
  0xdc   :  { %v214_v24 = vpop.f32.mrf.mxu0  ;;  %v294_v9 = vpop.f32.mrf.mxu1  ;;  %v271_v18 = vadd.f32 %v1619_v60, %v1617_v58 }
  0xdd   :  { %v343_v25 = vpack.c.bf16 %v314_v22, %v313_v21  ;;  %v215_v29 = vadd.f32 %v1617_v58, %v214_v24  ;;  %v319_v39 = vmax.f32 %v223_v31, 0.0  ;;  %v333_v22 = vmax.f32 %v279_v16, 0.0 }
  0xde   :  { %v1336_v27 = vpop.f32.mrf.mxu0  ;;  %v1356_v21 = vpop.f32.mrf.mxu1  ;;  %v334_v23 = vmax.f32 %v282_v17, 0.0  ;;  %v331_v24 = vmax.f32 %v271_v18, 0.0  ;;  %v290_v31 = vadd.f32 %v1352_v44, %v1617_v58  ;;  %v1679_v44 = vld [vmem:[%s1861_s2 + $0x3] ss:$0 sm:$0xff] }
  0xdf   :  { %v226_v30 = vadd.f32 %v1336_v27, %v1617_v58  ;;  %1369 = vmatprep.mubr.msk.bf16.mxu1 %vm385_vm1, %v343_v25  ;;  %v317_v37 = vmax.f32 %v215_v29, 0.0  ;;  %v332_v25 = vmax.f32 %v274_v20, 0.0  ;;  %v295_v29 = vadd.f32 %v1617_v58, %v294_v9 }
  0xe0   :  { %v217_v32 = vpop.f32.mrf.mxu0  ;;  %1370 = vmatmul.mubr.msk.bf16.gmra.mxu1 %vm385_vm1, %v344_v26  ;;  %v297_v26 = vpop.f32.mrf.mxu1  ;;  %v353_v27 = vpack.c.bf16 %v334_v23, %v333_v22 }
  0xe1   :  { %v218_v33 = vadd.f32 %v1617_v58, %v217_v32  ;;  %v320_v34 = vmax.f32 %v226_v30, 0.0  ;;  %v298_v60 = vadd.f32 %v1617_v58, %v297_v26  ;;  %v352_v30 = vpack.c.bf16 %v332_v25, %v331_v24 }
  0xe2   :  { %v1339_v35 = vpop.f32.mrf.mxu0  ;;  %v337_v32 = vmax.f32 %v295_v29, 0.0 }
  0xe3   :  { %v318_v38 = vmax.f32 %v218_v33, 0.0  ;;  %v346_v42 = vpack.c.bf16 %v320_v34, %v319_v39  ;;  %v239_v47 = vadd.f32 %v1339_v35, %v1617_v58  ;;  %v338_v33 = vmax.f32 %v298_v60, 0.0 }
  0xe4   :  { %v230_v40 = vpop.f32.mrf.mxu0  ;;  %v335_v34 = vmax.f32 %v287_v12, 0.0  ;;  %v336_v35 = vmax.f32 %v290_v31, 0.0  ;;  %v306_v39 = vadd.f32 %v1356_v21, %v1617_v58 }
  0xe5   :  { %v345_v41 = vpack.c.bf16 %v318_v38, %v317_v37  ;;  %v231_v45 = vadd.f32 %v1617_v58, %v230_v40  ;;  %v323_v55 = vmax.f32 %v239_v47, 0.0  ;;  %v355_v36 = vpack.c.bf16 %v338_v33, %v337_v32 }
  0xe6   :  { %v1340_v43 = vpop.f32.mrf.mxu0  ;;  %v354_v37 = vpack.c.bf16 %v336_v35, %v335_v34  ;;  %v303_v38 = vadd.f32 %v1355_v0, %v1617_v58  ;;  %v340_v40 = vmax.f32 %v306_v39, 0.0 }
  0xe7   :  { %v242_v46 = vadd.f32 %v1340_v43, %v1617_v58  ;;  %1373 = vmatprep.mubr.msk.bf16.mxu1 %vm385_vm1, %v345_v41  ;;  %v321_v53 = vmax.f32 %v231_v45, 0.0 }
  0xe8   :  { %v233_v48 = vpop.f32.mrf.mxu0  ;;  %1374 = vmatmul.mubr.msk.bf16.gmra.mxu1 %vm385_vm1, %v346_v42  ;;  %v339_v28 = vmax.f32 %v303_v38, 0.0 }
  0xe9   :  { %v234_v49 = vadd.f32 %v1617_v58, %v233_v48  ;;  %v324_v50 = vmax.f32 %v242_v46, 0.0 }
  0xea   :  { %v1343_v51 = vpop.f32.mrf.mxu0  ;;  %v356_v41 = vpack.c.bf16 %v340_v40, %v339_v28 }
  0xeb   :  { %v322_v54 = vmax.f32 %v234_v49, 0.0  ;;  %v348_v62 = vpack.c.bf16 %v324_v50, %v323_v55  ;;  %v255_v3 = vadd.f32 %v1343_v51, %v1617_v58 }
  0xec   :  { %v246_v56 = vpop.f32.mrf.mxu0 }
  0xed   :  { %v347_v57 = vpack.c.bf16 %v322_v54, %v321_v53  ;;  %v247_v1 = vadd.f32 %v1617_v58, %v246_v56  ;;  %v327_v13 = vmax.f32 %v255_v3, 0.0 }
  0xee   :  { %v1344_v63 = vpop.f32.mrf.mxu0 }
  0xef   :  { %v258_v2 = vadd.f32 %v1344_v63, %v1617_v58  ;;  %1377 = vmatprep.mubr.msk.bf16.mxu1 %vm385_vm1, %v347_v57  ;;  %v325_v10 = vmax.f32 %v247_v1, 0.0 }
  0xf0   :  { %v249_v5 = vpop.f32.mrf.mxu0  ;;  %1378 = vmatmul.mubr.msk.bf16.gmra.mxu1 %vm385_vm1, %v348_v62 }
  0xf1   :  { %v250_v7 = vadd.f32 %v1617_v58, %v249_v5  ;;  %v328_v8 = vmax.f32 %v258_v2, 0.0 }
  0xf3   :  { %v326_v11 = vmax.f32 %v250_v7, 0.0  ;;  %v350_v19 = vpack.c.bf16 %v328_v8, %v327_v13 }
  0xf5   :  { %v349_v14 = vpack.c.bf16 %v326_v11, %v325_v10 }
  0xf7   :  { %1381 = vmatprep.mubr.msk.bf16.mxu1 %vm385_vm1, %v349_v14 }
  0xf8   :  { %1382 = vmatmul.mubr.msk.bf16.gmra.mxu1 %vm385_vm1, %v350_v19 }
  0xf9   :  { %1385 = vmatprep.mubr.msk.bf16.mxu1 %vm385_vm1, %v351_v15 }
 0x100   :  { %1386 = vmatmul.mubr.msk.bf16.gmra.mxu1 %vm385_vm1, %v352_v30 }
 0x101   :  { %1389 = vmatprep.mubr.msk.bf16.mxu1 %vm385_vm1, %v353_v27 }
 0x108   :  { %1390 = vmatmul.mubr.msk.bf16.gmra.mxu1 %vm385_vm1, %v354_v37 }
 0x109   :  { %1393 = vmatprep.mubr.msk.bf16.mxu1 %vm385_vm1, %v355_v36 }
 0x110   :  { %1394 = vmatmul.mubr.msk.bf16.gmra.mxu1 %vm385_vm1, %v356_v41 }
 0x198   :  { %v1367_v42 = vpop.f32.mrf.mxu1 }
 0x199   :  { %v477_v47 = vadd.f32 %v1367_v42, %v1679_v44 }
 0x19a   :  { %v468_v43 = vpop.f32.mrf.mxu1 }
 0x19b   :  { %v469_v46 = vadd.f32 %v1679_v44, %v468_v43  ;;  %v597_v54 = vmax.f32 %v477_v47, 0.0 }
 0x19c   :  { %v1368_v45 = vpop.f32.mrf.mxu1 }
 0x19d   :  { %v480_v58 = vadd.f32 %v1368_v45, %v1679_v44  ;;  %v595_v52 = vmax.f32 %v469_v46, 0.0 }
 0x19e   :  { %v471_v48 = vpop.f32.mrf.mxu1 }
 0x19f   :  { %v472_v49 = vadd.f32 %v1679_v44, %v471_v48  ;;  %v598_v50 = vmax.f32 %v480_v58, 0.0 }
 0x1a0   :  { %v1371_v51 = vpop.f32.mrf.mxu1 }
 0x1a1   :  { %v596_v53 = vmax.f32 %v472_v49, 0.0  ;;  %v628_v57 = vpack.c.bf16 %v598_v50, %v597_v54  ;;  %v493_v63 = vadd.f32 %v1371_v51, %v1679_v44 }
 0x1a2   :  { %v484_v55 = vpop.f32.mrf.mxu1 }
 0x1a3   :  { %v627_v56 = vpack.c.bf16 %v596_v53, %v595_v52  ;;  %v485_v61 = vadd.f32 %v1679_v44, %v484_v55  ;;  %v601_v7 = vmax.f32 %v493_v63, 0.0 }
 0x1a4   :  { %v1372_v59 = vpop.f32.mrf.mxu1 }
 0x1a5   :  { %v496_v62 = vadd.f32 %v1372_v59, %v1679_v44  ;;  %1401 = vmatprep.mubr.msk.bf16.mxu0 %vm99_vm0, %v627_v56  ;;  %v599_v5 = vmax.f32 %v485_v61, 0.0 }
 0x1a6   :  { %v487_v0 = vpop.f32.mrf.mxu1  ;;  %1402 = vmatmul.mubr.msk.bf16.vlgmr.msra.gmra.mxu0 %vm99_vm0, %v628_v57 }
 0x1a7   :  { %v488_v1 = vadd.f32 %v1679_v44, %v487_v0  ;;  %v602_v2 = vmax.f32 %v496_v62, 0.0 }
 0x1a8   :  { %v1375_v3 = vpop.f32.mrf.mxu1 }
 0x1a9   :  { %v600_v6 = vmax.f32 %v488_v1, 0.0  ;;  %v630_v9 = vpack.c.bf16 %v602_v2, %v601_v7  ;;  %v509_v14 = vadd.f32 %v1375_v3, %v1679_v44 }
 0x1aa   :  { %v500_v4 = vpop.f32.mrf.mxu1 }
 0x1ab   :  { %v629_v8 = vpack.c.bf16 %v600_v6, %v599_v5  ;;  %v501_v11 = vadd.f32 %v1679_v44, %v500_v4  ;;  %v605_v21 = vmax.f32 %v509_v14, 0.0 }
 0x1ac   :  { %v1376_v10 = vpop.f32.mrf.mxu1 }
 0x1ad   :  { %v512_v13 = vadd.f32 %v1376_v10, %v1679_v44  ;;  %1405 = vmatprep.mubr.msk.bf16.mxu0 %vm99_vm0, %v629_v8  ;;  %v603_v19 = vmax.f32 %v501_v11, 0.0 }
 0x1ae   :  { %v503_v15 = vpop.f32.mrf.mxu1  ;;  %1406 = vmatmul.mubr.msk.bf16.gmra.mxu0 %vm99_vm0, %v630_v9 }
 0x1af   :  { %v504_v16 = vadd.f32 %v1679_v44, %v503_v15  ;;  %v606_v17 = vmax.f32 %v512_v13, 0.0 }
 0x1b0   :  { %v1379_v18 = vpop.f32.mrf.mxu1 }
 0x1b1   :  { %v604_v20 = vmax.f32 %v504_v16, 0.0  ;;  %v632_v24 = vpack.c.bf16 %v606_v17, %v605_v21  ;;  %v525_v29 = vadd.f32 %v1379_v18, %v1679_v44 }
 0x1b2   :  { %v516_v22 = vpop.f32.mrf.mxu1 }
 0x1b3   :  { %v631_v23 = vpack.c.bf16 %v604_v20, %v603_v19  ;;  %v517_v26 = vadd.f32 %v1679_v44, %v516_v22  ;;  %v609_v34 = vmax.f32 %v525_v29, 0.0 }
 0x1b4   :  { %v1380_v25 = vpop.f32.mrf.mxu1 }
 0x1b5   :  { %v528_v27 = vadd.f32 %v1380_v25, %v1679_v44  ;;  %1409 = vmatprep.mubr.msk.bf16.mxu0 %vm99_vm0, %v631_v23  ;;  %v607_v32 = vmax.f32 %v517_v26, 0.0 }
 0x1b6   :  { %v519_v60 = vpop.f32.mrf.mxu1  ;;  %1410 = vmatmul.mubr.msk.bf16.gmra.mxu0 %vm99_vm0, %v632_v24 }
 0x1b7   :  { %v520_v30 = vadd.f32 %v1679_v44, %v519_v60  ;;  %v610_v12 = vmax.f32 %v528_v27, 0.0 }
 0x1b8   :  { %v1383_v31 = vpop.f32.mrf.mxu1 }
 0x1b9   :  { %v608_v33 = vmax.f32 %v520_v30, 0.0  ;;  %v634_v37 = vpack.c.bf16 %v610_v12, %v609_v34  ;;  %v541_v40 = vadd.f32 %v1383_v31, %v1679_v44  ;;  %v1732_v30 = vld [vmem:[%s1861_s2] sm:$0x3]  ;;  %v1456_v31 = vmov 32  }
 0x1ba   :  { %v532_v35 = vpop.f32.mrf.mxu1  ;;  %1319 = vmatprep.mubr.msk.f32.mxu1 %vm99_vm0, %v1732_v30  ;;  %1439 = vset.pattern.permute.xlu0 %v1456_v31 }
 0x1bb   :  { %v633_v36 = vpack.c.bf16 %v608_v33, %v607_v32  ;;  %v533_v39 = vadd.f32 %v1679_v44, %v532_v35  ;;  %v613_v47 = vmax.f32 %v541_v40, 0.0  ;;  %902 = vperm.xlu0 %1439, %v1732_v30  }
 0x1bc   :  { %v1384_v38 = vpop.f32.mrf.mxu1 }
 0x1bd   :  { %v544_v28 = vadd.f32 %v1384_v38, %v1679_v44  ;;  %1413 = vmatprep.mubr.msk.bf16.mxu0 %vm99_vm0, %v633_v36  ;;  %v611_v46 = vmax.f32 %v533_v39, 0.0 }
 0x1be   :  { %v535_v41 = vpop.f32.mrf.mxu1  ;;  %1414 = vmatmul.mubr.msk.bf16.gmra.mxu0 %vm99_vm0, %v634_v37 }
 0x1bf   :  { %v536_v42 = vadd.f32 %v1679_v44, %v535_v41  ;;  %v614_v43 = vmax.f32 %v544_v28, 0.0 }
 0x1c0   :  { %v1387_v45 = vpop.f32.mrf.mxu1 }
 0x1c1   :  { %v612_v58 = vmax.f32 %v536_v42, 0.0  ;;  %v636_v50 = vpack.c.bf16 %v614_v43, %v613_v47  ;;  %v557_v54 = vadd.f32 %v1387_v45, %v1679_v44 }
 0x1c2   :  { %v548_v48 = vpop.f32.mrf.mxu1 }
 0x1c3   :  { %v635_v49 = vpack.c.bf16 %v612_v58, %v611_v46  ;;  %v549_v52 = vadd.f32 %v1679_v44, %v548_v48  ;;  %v617_v63 = vmax.f32 %v557_v54, 0.0 }
 0x1c4   :  { %v1388_v51 = vpop.f32.mrf.mxu1 }
 0x1c5   :  { %v560_v53 = vadd.f32 %v1388_v51, %v1679_v44  ;;  %1417 = vmatprep.mubr.msk.bf16.mxu0 %vm99_vm0, %v635_v49  ;;  %v615_v61 = vmax.f32 %v549_v52, 0.0 }
 0x1c6   :  { %v551_v55 = vpop.f32.mrf.mxu1  ;;  %1418 = vmatmul.mubr.msk.bf16.gmra.mxu0 %vm99_vm0, %v636_v50 }
 0x1c7   :  { %v552_v56 = vadd.f32 %v1679_v44, %v551_v55  ;;  %v618_v57 = vmax.f32 %v560_v53, 0.0 }
 0x1c8   :  { %v1391_v59 = vpop.f32.mrf.mxu1 }
 0x1c9   :  { %v616_v62 = vmax.f32 %v552_v56, 0.0  ;;  %v638_v2 = vpack.c.bf16 %v618_v57, %v617_v63  ;;  %v573_v7 = vadd.f32 %v1391_v59, %v1679_v44 }
 0x1ca   :  { %v564_v0 = vpop.f32.mrf.mxu1 }
 0x1cb   :  { %v637_v1 = vpack.c.bf16 %v616_v62, %v615_v61  ;;  %v565_v5 = vadd.f32 %v1679_v44, %v564_v0  ;;  %v621_v14 = vmax.f32 %v573_v7, 0.0  ;;  %v1770_v61 = vld [vmem:[%s1861_s2 + $0x4] ss:$0 sm:$0xff] }
 0x1cc   :  { %v1392_v3 = vpop.f32.mrf.mxu1 }
 0x1cd   :  { %v576_v6 = vadd.f32 %v1392_v3, %v1679_v44  ;;  %1421 = vmatprep.mubr.msk.bf16.mxu0 %vm99_vm0, %v637_v1  ;;  %v619_v11 = vmax.f32 %v565_v5, 0.0 }
 0x1ce   :  { %v567_v4 = vpop.f32.mrf.mxu1  ;;  %1422 = vmatmul.mubr.msk.bf16.gmra.mxu0 %vm99_vm0, %v638_v2 }
 0x1cf   :  { %v568_v8 = vadd.f32 %v1679_v44, %v567_v4  ;;  %v622_v9 = vmax.f32 %v576_v6, 0.0 }
 0x1d0   :  { %v1395_v10 = vpop.f32.mrf.mxu1 }
 0x1d1   :  { %v620_v13 = vmax.f32 %v568_v8, 0.0  ;;  %v640_v17 = vpack.c.bf16 %v622_v9, %v621_v14  ;;  %v589_v21 = vadd.f32 %v1395_v10, %v1679_v44 }
 0x1d2   :  { %v580_v15 = vpop.f32.mrf.mxu1 }
 0x1d3   :  { %v639_v16 = vpack.c.bf16 %v620_v13, %v619_v11  ;;  %v581_v19 = vadd.f32 %v1679_v44, %v580_v15  ;;  %v625_v27 = vmax.f32 %v589_v21, 0.0 }
 0x1d4   :  { %v1396_v18 = vpop.f32.mrf.mxu1 }
 0x1d5   :  { %v592_v20 = vadd.f32 %v1396_v18, %v1679_v44  ;;  %1425 = vmatprep.mubr.msk.bf16.mxu0 %vm99_vm0, %v639_v16  ;;  %v623_v25 = vmax.f32 %v581_v19, 0.0 }
 0x1d6   :  { %v583_v22 = vpop.f32.mrf.mxu1  ;;  %1426 = vmatmul.mubr.msk.bf16.gmra.mxu0 %vm99_vm0, %v640_v17 }
 0x1d7   :  { %v584_v23 = vadd.f32 %v1679_v44, %v583_v22  ;;  %v626_v24 = vmax.f32 %v592_v20, 0.0 }
 0x1d9   :  { %v624_v26 = vmax.f32 %v584_v23, 0.0  ;;  %v642_v60 = vpack.c.bf16 %v626_v24, %v625_v27 }
 0x1db   :  { %v641_v29 = vpack.c.bf16 %v624_v26, %v623_v25 }
 0x1dd   :  { %1429 = vmatprep.mubr.msk.bf16.mxu0 %vm99_vm0, %v641_v29 }
 0x1de   :  { %1430 = vmatmul.mubr.msk.bf16.gmra.mxu0 %vm99_vm0, %v642_v60 }
 0x266   :  { %v1736_v12 = vpop.f32.mrf.mxu0 }
 0x268   :  { %v1738_v44 = vpop.f32.mrf.mxu0 }
 0x26a   :  { %v1741_v32 = vpop.f32.mrf.mxu0 }
 0x26c   :  { %v1743_v33 = vpop.f32.mrf.mxu0 }
 0x26e   :  { %v1745_v34 = vpop.f32.mrf.mxu0 }
 0x270   :  { %v1747_v35 = vpop.f32.mrf.mxu0 }
 0x272   :  { %v1749_v36 = vpop.f32.mrf.mxu0 }
 0x274   :  { %v1751_v37 = vpop.f32.mrf.mxu0 }
 0x276   :  { %v1411_v38 = vpop.f32.mrf.mxu0 }
 0x277   :  { %v782_v21 = vadd.f32 %v1411_v38, %v1770_v61 }
 0x278   :  { %v1753_v39 = vpop.f32.mrf.mxu0 }
 0x279   :  { %v878_v25 = vmax.f32 %v782_v21, 0.0  ;;  %v774_v60 = vadd.f32 %v1770_v61, %v1753_v39  ;;  %v766_v39 = vadd.f32 %v1745_v34, %v1770_v61  ;;  %v758_v34 = vadd.f32 %v1770_v61, %v1747_v35 }
 0x27a   :  { %v1412_v28 = vpop.f32.mrf.mxu0  ;;  %v750_v35 = vadd.f32 %v1736_v12, %v1770_v61  ;;  %v742_v12 = vadd.f32 %v1770_v61, %v1738_v44 }
 0x27b   :  { %v785_v17 = vadd.f32 %v1412_v28, %v1770_v61 }
 0x27c   :  { %v776_v40 = vpop.f32.mrf.mxu0 }
 0x27d   :  { %v879_v22 = vmax.f32 %v785_v17, 0.0  ;;  %v777_v26 = vadd.f32 %v1770_v61, %v776_v40  ;;  %v769_v40 = vadd.f32 %v1749_v36, %v1770_v61  ;;  %v874_v36 = vmax.f32 %v766_v39, 0.0 }
 0x27e   :  { %v1415_v41 = vpop.f32.mrf.mxu0 }
 0x27f   :  { %v798_v5 = vadd.f32 %v1415_v41, %v1770_v61  ;;  %v877_v31 = vmax.f32 %v777_v26, 0.0  ;;  %v876_v41 = vmax.f32 %v774_v60, 0.0 }
 0x280   :  { %v789_v42 = vpop.f32.mrf.mxu0 }
 0x281   :  { %v882_v8 = vmax.f32 %v798_v5, 0.0  ;;  %v790_v13 = vadd.f32 %v1770_v61, %v789_v42  ;;  %v868_v5 = vmax.f32 %v742_v12, 0.0 }
 0x282   :  { %v1416_v43 = vpop.f32.mrf.mxu0 }
 0x283   :  { %v801_v62 = vadd.f32 %v1416_v43, %v1770_v61  ;;  %v880_v18 = vmax.f32 %v790_v13, 0.0 }
 0x284   :  { %v792_v45 = vpop.f32.mrf.mxu0 }
 0x285   :  { %v883_v6 = vmax.f32 %v801_v62, 0.0  ;;  %v793_v9 = vadd.f32 %v1770_v61, %v792_v45  ;;  %v875_v45 = vmax.f32 %v769_v40, 0.0 }
 0x286   :  { %v1755_v46 = vpop.f32.mrf.mxu0 }
 0x287   :  { %v881_v14 = vmax.f32 %v793_v9, 0.0 }
 0x288   :  { %v1757_v58 = vpop.f32.mrf.mxu0 }
 0x28a   :  { %v1759_v47 = vpop.f32.mrf.mxu0 }
 0x28c   :  { %v1761_v48 = vpop.f32.mrf.mxu0 }
 0x28e   :  { %v1423_v49 = vpop.f32.mrf.mxu0 }
 0x28f   :  { %v830_v42 = vadd.f32 %v1423_v49, %v1770_v61  ;;  %v761_v49 = vadd.f32 %v1770_v61, %v1751_v37  ;;  %v753_v37 = vadd.f32 %v1741_v32, %v1770_v61  ;;  %v870_v32 = vmax.f32 %v750_v35, 0.0 }
 0x290   :  { %v1763_v50 = vpop.f32.mrf.mxu0 }
 0x292   :  { %v1424_v51 = vpop.f32.mrf.mxu0 }
 0x293   :  { %v833_v38 = vadd.f32 %v1424_v51, %v1770_v61  ;;  %v890_v51 = vmax.f32 %v830_v42, 0.0 }
 0x294   :  { %v1765_v52 = vpop.f32.mrf.mxu0 }
 0x295   :  { %v891_v43 = vmax.f32 %v833_v38, 0.0 }
 0x296   :  { %v1427_v53 = vpop.f32.mrf.mxu0 }
 0x297   :  { %v846_v19 = vadd.f32 %v1427_v53, %v1770_v61  ;;  %v825_v53 = vadd.f32 %v1770_v61, %v1765_v52  ;;  %v873_v52 = vmax.f32 %v761_v49, 0.0 }
 0x298   :  { %v837_v54 = vpop.f32.mrf.mxu0 }
 0x299   :  { %v894_v23 = vmax.f32 %v846_v19, 0.0  ;;  %v838_v27 = vadd.f32 %v1770_v61, %v837_v54  ;;  %v822_v54 = vadd.f32 %v1770_v61, %v1763_v50  ;;  %v872_v50 = vmax.f32 %v758_v34, 0.0 }
 0x29a   :  { %v1428_v55 = vpop.f32.mrf.mxu0 }
 0x29b   :  { %v849_v15 = vadd.f32 %v1428_v55, %v1770_v61  ;;  %v892_v28 = vmax.f32 %v838_v27, 0.0  ;;  %v889_v55 = vmax.f32 %v825_v53, 0.0 }
 0x29c   :  { %v840_v56 = vpop.f32.mrf.mxu0 }
 0x29d   :  { %v895_v20 = vmax.f32 %v849_v15, 0.0  ;;  %v841_v24 = vadd.f32 %v1770_v61, %v840_v56  ;;  %v817_v56 = vadd.f32 %v1759_v47, %v1770_v61  ;;  %v871_v47 = vmax.f32 %v753_v37, 0.0 }
 0x29e   :  { %v1431_v57 = vpop.f32.mrf.mxu0 }
 0x29f   :  { %v862_v0 = vadd.f32 %v1431_v57, %v1770_v61  ;;  %v893_v29 = vmax.f32 %v841_v24, 0.0  ;;  %v888_v57 = vmax.f32 %v822_v54, 0.0  ;;  %v887_v62 = vmax.f32 %v817_v56, 0.0 }
 0x2a0   :  { %v853_v59 = vpop.f32.mrf.mxu0 }
 0x2a1   :  { %v898_v7 = vmax.f32 %v862_v0, 0.0  ;;  %v854_v10 = vadd.f32 %v1770_v61, %v853_v59  ;;  %v814_v59 = vadd.f32 %v1755_v46, %v1770_v61  ;;  %v809_v0 = vadd.f32 %v1770_v61, %v1761_v48 }
 0x2a2   :  { %v1432_v63 = vpop.f32.mrf.mxu0  ;;  %v745_v46 = vadd.f32 %v1770_v61, %v1743_v33  ;;  %v1457_v33 = vmov 1966171168  }
 0x2a3   :  { %v865_v1 = vadd.f32 %v1432_v63, %v1770_v61  ;;  %v896_v16 = vmax.f32 %v854_v10, 0.0  ;;  %v886_v63 = vmax.f32 %v814_v59, 0.0 }
 0x2a4   :  { %v856_v2 = vpop.f32.mrf.mxu0  ;;  %v869_v48 = vmax.f32 %v745_v46, 0.0 }
 0x2a5   :  { %v899_v3 = vmax.f32 %v865_v1, 0.0  ;;  %v857_v4 = vadd.f32 %v1770_v61, %v856_v2  ;;  %v806_v1 = vadd.f32 %v1770_v61, %v1757_v58  ;;  %v885_v2 = vmax.f32 %v809_v0, 0.0 }
 0x2a6   :  { %v1080_v58 = vunpack.c.l.s4 %v1457_v33 }
 0x2a7   :  { %1287 = vmatprep.subr.msk.mxu1 %vm99_vm0, %v899_v3  ;;  %v897_v11 = vmax.f32 %v857_v4, 0.0  ;;  %v884_v3 = vmax.f32 %v806_v1, 0.0 }
 0x2a8   :  { %1288 = vmatpush3.xpose.msk.msra.mxu1 %vm99_vm0, %v883_v6  ;;  %v1082_v6 = vlaneseq }
 0x2a9   :  { %1289 = vmatprep.subr.msk.mxu1 %vm99_vm0, %v898_v7  ;;  %v903_v7 = vpop.permute.xlu0 %902 }
 0x2aa   :  { %v1083_v9 = vshrl.u32 %v1082_v6, 7  ;;  %vm1096_vm2 = vcmp.lt.s32.totalorder %v1082_v6, 256 }
 0x2ac   :  { %1290 = vmatpush3.xpose.msk.msra.mxu1 %vm99_vm0, %v882_v8  ;;  %v1081_v8 = vunpack.c.0.s8 %v1080_v58 }
 0x2ad   :  { %1291 = vmatprep.subr.msk.mxu1 %vm99_vm0, %v897_v11 }
 0x2ae   :  { %v1084_v13 = vsub.s32 %v1081_v8, %v1083_v9 }
 0x2b0   :  { %1292 = vmatpush3.xpose.msk.msra.mxu1 %vm99_vm0, %v881_v14 }
 0x2b1   :  { %1293 = vmatprep.subr.msk.mxu1 %vm99_vm0, %v896_v16 }
 0x2b4   :  { %1294 = vmatpush3.xpose.msk.msra.mxu1 %vm99_vm0, %v880_v18 }
 0x2b5   :  { %1295 = vmatprep.subr.msk.mxu1 %vm99_vm0, %v895_v20 }
 0x2b8   :  { %1296 = vmatpush3.xpose.msk.msra.mxu1 %vm99_vm0, %v879_v22 }
 0x2b9   :  { %1297 = vmatprep.subr.msk.mxu1 %vm99_vm0, %v894_v23 }
 0x2bc   :  { %1298 = vmatpush3.xpose.msk.msra.mxu1 %vm99_vm0, %v878_v25 }
 0x2bd   :  { %1299 = vmatprep.subr.msk.mxu1 %vm99_vm0, %v893_v29 }
 0x2c0   :  { %1300 = vmatpush3.xpose.msk.msra.mxu1 %vm99_vm0, %v877_v31 }
 0x2c1   :  { %1301 = vmatprep.subr.msk.mxu1 %vm99_vm0, %v892_v28 }
 0x2c4   :  { %1302 = vmatpush3.xpose.msk.msra.mxu1 %vm99_vm0, %v876_v41 }
 0x2c5   :  { %1303 = vmatprep.subr.msk.mxu1 %vm99_vm0, %v891_v43 }
 0x2c8   :  { %1304 = vmatpush3.xpose.msk.msra.mxu1 %vm99_vm0, %v875_v45 }
 0x2c9   :  { %1305 = vmatprep.subr.msk.mxu1 %vm99_vm0, %v890_v51 }
 0x2cc   :  { %1306 = vmatpush3.xpose.msk.msra.mxu1 %vm99_vm0, %v874_v36 }
 0x2cd   :  { %1307 = vmatprep.subr.msk.mxu1 %vm99_vm0, %v889_v55 }
 0x2d0   :  { %1308 = vmatpush3.xpose.msk.msra.mxu1 %vm99_vm0, %v873_v52 }
 0x2d1   :  { %1309 = vmatprep.subr.msk.mxu1 %vm99_vm0, %v888_v57 }
 0x2d4   :  { %1310 = vmatpush3.xpose.msk.msra.mxu1 %vm99_vm0, %v872_v50 }
 0x2d5   :  { %1311 = vmatprep.subr.msk.mxu1 %vm99_vm0, %v887_v62 }
 0x2d8   :  { %1312 = vmatpush3.xpose.msk.msra.mxu1 %vm99_vm0, %v871_v47 }
 0x2d9   :  { %1313 = vmatprep.subr.msk.mxu1 %vm99_vm0, %v886_v63 }
 0x2dc   :  { %1314 = vmatpush3.xpose.msk.msra.mxu1 %vm99_vm0, %v870_v32 }
 0x2dd   :  { %1315 = vmatprep.subr.msk.mxu1 %vm99_vm0, %v885_v2 }
 0x2e0   :  { %1316 = vmatpush3.xpose.msk.msra.mxu1 %vm99_vm0, %v869_v48 }
 0x2e1   :  { %1317 = vmatprep.subr.msk.mxu1 %vm99_vm0, %v884_v3 }
 0x2e4   :  { %1318 = vmatpush3.xpose.msk.msra.mxu1 %vm99_vm0, %v868_v5 }
 0x2e7   :  { %1320 = vmatmul.mubr.msk.f32.vlgmr.msra.gmra.mxu1 %vm99_vm0, %v1732_v30 }
 0x3a7   :  { %v1069_v4 = vpop.f32.mrf.mxu1 }
 0x3a8   :  { %v1070_v44 = vadd.f32 %v1069_v4, %v903_v7 }
 0x3a9   :  { %v1071_v61 = vpop.f32.mrf.mxu1 }
 0x3aa   :  { %v1228_v10 = vmul.f32 -1.442695, %v1070_v44  ;;  %v1072_v11 = vadd.f32 %v1071_v61, %v903_v7  ;;  %v1074_v14 = vmax.f32 %v1070_v44, 0.0 }
 0x3ac   :  { %1448 = vpow2.f32 %v1228_v10  ;;  %v1075_v15 = vmax.f32 %v1072_v11, 0.0  ;;  %v1229_v16 = vmul.f32 -1.442695, %v1072_v11 }
 0x3ae   :  { %v1078_v17 = vcombine.low %v1074_v14, %v1075_v15  ;;  %1450 = vpow2.f32 %v1229_v16 }
 0x3b0   :  { %v1085_v18 = vrot.slane %v1078_v17, %v1084_v13 }
 0x3b2   :  { %v1092_v30 = vrot.slane %v1085_v18, %v1084_v13 }
 0x3b4   :  { %1098 = vst.msk [vmem:[%s1862_s3] ss:$2 sm:$0x3] %vm1096_vm2, %v1092_v30 }
 0x3b9   :  { %v1449_v19 = vpop.eup %1448 }
 0x3ba   :  { %v1105_v20 = vadd.f32 1.0, %v1449_v19 }
 0x3bb   :  { %v1451_v21 = vpop.eup %1450 }
 0x3bc   :  { %v1106_v22 = vadd.f32 1.0, %v1451_v21  ;;  %1452 = vrcp.f32 %v1105_v20 }
 0x3be   :  { %1454 = vrcp.f32 %v1106_v22 }
 0x3c9   :  { %v1453_v23 = vpop.eup %1452 }
 0x3cb   :  { %v1455_v24 = vpop.eup %1454 }
 0x3cc   :  { %v1113_v25 = vcombine.low %v1453_v23, %v1455_v24 }
 0x3ce   :  { %v1120_v26 = vrot.slane %v1113_v25, %v1084_v13 }
 0x3d0   :  { %v1121_v27 = vcombine.high %v1120_v26, %v1120_v26 }
 0x3d2   :  { %v1128_v29 = vrot.slane %v1121_v27, %v1084_v13 }
 0x3d4   :  { %1230 = vst.msk [vmem:[%s1862_s3 + $0x1] ss:$2 sm:$0x3] %vm1096_vm2, %v1128_v29 }

</bundles_post_ra>
